<compile_context>
chip_gen: v5e
topology: v5e:2x2
jax: 0.10.0
libtpu: 0.0.40
codegen_flags: <defaults>
</compile_context>

<pallas_src>
import functools

import jax
import jax.numpy as jnp
from jax.experimental import pallas as pl
from jax.experimental.pallas import tpu as pltpu


def _round_up(x, m):
    return ((x + m - 1) // m) * m


# ----------------------------------------------------------------------------
# Pallas kernel: streaming loss pass over one R-tile (all arrays lane-dense in R)
#   inputs : ploc_t   (4, T)        f32   predicted boxes
#            mpos_t   (4, T)        f32   matched gt boxes
#            pos_t    (1, T)        f32   per-box positive indicator (0/1)
#            cls_t    (1, T)        int32 matched class index (-1 if negative)
#            plabel_t (Cpad8, T)    f32   class logits (padded classes = 0)
#   outputs: con_neg  (Cpad8, T)    f32   (1-target)*bce   (for hard-neg mining)
#            partial  (1, 1, 128)   f32   lane0 = loss_l, lane1 = closs_pos
# ----------------------------------------------------------------------------
def _ssd_loss_kernel(ploc_ref, mpos_ref, pos_ref, cls_ref, plabel_ref,
                     conneg_ref, partial_ref):
    pos = pos_ref[...]                                   # (1, T)

    # ---- Localization: SmoothL1 (beta=1) on positive boxes -----------------
    d = ploc_ref[...] - mpos_ref[...]                    # (4, T)
    ad = jnp.abs(d)
    sl1 = jnp.where(ad < 1.0, 0.5 * d * d, ad - 0.5)     # (4, T)
    # reference: (m_iou * loss_l_row).sum(); rows of m_iou are one-hot-or-zero,
    # so multiplying by the per-row positive indicator is identical.
    loss_l_p = jnp.sum(sl1 * pos)                        # scalar

    # ---- Confidence: BCEWithLogits (stable formulation), f32 math ----------
    logits = plabel_ref[...]                             # (Cpad8, T) f32
    cls_idx = cls_ref[...]                               # (1, T) int32
    class_iota = jax.lax.broadcasted_iota(jnp.int32, logits.shape, 0)
    target = (class_iota == cls_idx).astype(jnp.float32)  # one-hot-or-zero rows
    bce = (jnp.maximum(logits, 0.0) - logits * target
           + jnp.log1p(jnp.exp(-jnp.abs(logits))))       # (Cpad8, T)
    bce_pos = bce * target
    closs_pos_p = jnp.sum(bce_pos)                       # scalar
    conneg_ref[...] = bce - bce_pos                      # (1-target)*bce

    # ---- Per-tile partial sums: single lane-iota select ---------------------
    lane = jax.lax.broadcasted_iota(jnp.int32, (1, 1, 128), 2)
    partial_ref[...] = jnp.where(
        lane == 0, loss_l_p, jnp.where(lane == 1, closs_pos_p, 0.0))


# ----------------------------------------------------------------------------
# Plain-JAX glue: default-box <-> ground-truth matching
# ----------------------------------------------------------------------------
def _iou(dboxes, gt):
    """IoU matrix between (N,4) default boxes and (M,4) gt boxes (ltrb)."""
    lt = jnp.maximum(dboxes[:, None, :2], gt[None, :, :2])
    rb = jnp.minimum(dboxes[:, None, 2:], gt[None, :, 2:])
    wh = jnp.clip(rb - lt, 0.0, None)
    inter = wh[..., 0] * wh[..., 1]
    area_d = (dboxes[:, 2] - dboxes[:, 0]) * (dboxes[:, 3] - dboxes[:, 1])
    area_g = (gt[:, 2] - gt[:, 0]) * (gt[:, 3] - gt[:, 1])
    union = area_d[:, None] + area_g[None, :] - inter
    return inter / jnp.maximum(union, 1e-10)


def _match_one(dboxes, gtloc_b, gtlabel_b, threshold):
    # TODO(synk): compare_trgets_with_bbox is not defined in the reference
    # file; canonical SSD best-gt matching is used: per default box take the
    # best-IoU gt; positive iff IoU > threshold; the target is the gt box plus
    # the gt class index (-1 for negatives, i.e. an all-zero one-hot row).
    iou = _iou(dboxes, gtloc_b)                        # (N, M)
    best_iou = jnp.max(iou, axis=1)
    best_idx = jnp.argmax(iou, axis=1)
    pos = best_iou > threshold                         # (N,) bool
    matched_loc = gtloc_b[best_idx]                    # (N, 4)
    cls_idx = jnp.where(pos, gtlabel_b[best_idx].astype(jnp.int32), -1)
    return matched_loc, cls_idx, pos.astype(jnp.float32)


# ----------------------------------------------------------------------------
# Wrapper: matching + lane-dense packing + tiled pallas_call + hard-neg mining
# ----------------------------------------------------------------------------
@functools.partial(jax.jit,
                   static_argnames=("match_threshold", "num_classes",
                                    "neg_topk_cap"))
def ssd_loss(ploc, plabel, gtloc, gtlabel, dboxes, match_threshold, num_classes,
             neg_topk_cap=1024):
    B, N, _ = ploc.shape
    C = num_classes
    R = B * N
    f32 = jnp.float32

    matched_loc, cls_idx, pos = jax.vmap(
        lambda gl, gc: _match_one(dboxes, gl, gc, match_threshold)
    )(gtloc, gtlabel)
    cls_full = cls_idx.reshape(R)                       # (R,) int32, -1 = negative
    pos_full = pos.reshape(R)                           # (R,) f32

    # ---- Tiling (R on the lane axis; classes packed into sublanes) ----------
    R_pad128 = _round_up(max(R, 1), 128)
    if R_pad128 >= 256:
        # >= 2 tiles so the "parallel" grid axis can feed both v7x TensorCores
        TILE_R = max(128, min(2048, (R_pad128 // 2 // 128) * 128))
    else:
        TILE_R = 128
    R_pad = _round_up(R_pad128, TILE_R)
    num_tiles = R_pad // TILE_R
    C_pad8 = _round_up(C, 8)

    pad_r = R_pad - R
    ploc_t = jnp.pad(ploc.reshape(R, 4).astype(f32).T, ((0, 0), (0, pad_r)))
    mpos_t = jnp.pad(matched_loc.reshape(R, 4).astype(f32).T, ((0, 0), (0, pad_r)))
    pos_t = jnp.pad(pos_full.reshape(1, R), ((0, 0), (0, pad_r)))
    cls_t = jnp.pad(cls_full.reshape(1, R), ((0, 0), (0, pad_r)),
                    constant_values=-1)
    plabel_t = jnp.pad(plabel.reshape(R, C).astype(f32).T,
                       ((0, C_pad8 - C), (0, pad_r)))

    bytes_accessed = ((4 + 4 + 1 + 1) * R_pad * 4        # box planes + pos + cls
                      + C_pad8 * R_pad * 4               # logits in
                      + C_pad8 * R_pad * 4               # con_neg out
                      + num_tiles * 128 * 4)             # partials out

    con_neg_full, partials = pl.pallas_call(
        _ssd_loss_kernel,
        out_shape=(jax.ShapeDtypeStruct((C_pad8, R_pad), jnp.float32),
                   jax.ShapeDtypeStruct((num_tiles, 1, 128), jnp.float32)),
        grid_spec=pltpu.PrefetchScalarGridSpec(
            num_scalar_prefetch=0,
            grid=(num_tiles,),
            in_specs=[
                pl.BlockSpec((4, TILE_R), lambda i: (0, i)),
                pl.BlockSpec((4, TILE_R), lambda i: (0, i)),
                pl.BlockSpec((1, TILE_R), lambda i: (0, i)),
                pl.BlockSpec((1, TILE_R), lambda i: (0, i)),
                pl.BlockSpec((C_pad8, TILE_R), lambda i: (0, i)),
            ],
            out_specs=[
                pl.BlockSpec((C_pad8, TILE_R), lambda i: (0, i)),
                pl.BlockSpec((1, 1, 128), lambda i: (i, 0, 0)),
            ],
        ),
        compiler_params=pltpu.CompilerParams(
            dimension_semantics=("parallel",)),
        cost_estimate=pl.CostEstimate(
            flops=12 * C_pad8 * R_pad + 8 * 4 * R_pad,
            transcendentals=2 * C_pad8 * R_pad,
            bytes_accessed=bytes_accessed),
    )(ploc_t, mpos_t, pos_t, cls_t, plabel_t)

    loss_l = jnp.sum(partials[:, 0, 0])
    closs_pos = jnp.sum(partials[:, 0, 1])

    # ---- Hard negative mining: keep the 3*pos_num[c] largest negative ------
    # losses per class.  Exact-k selection via per-class top_k with a static
    # cap (review: full (R,C) sort dominates wall clock at real SSD sizes).
    # Padded classes / rows carry bce=log(2); the [:C, :R] slice drops them.
    con_neg = con_neg_full[:C, :R]                      # (C, R)
    pos_num = jnp.zeros((C,), f32).at[
        jnp.where(cls_full >= 0, cls_full, 0)
    ].add(jnp.where(cls_full >= 0, 1.0, 0.0))           # (C,)
    k_cap = int(min(R, int(neg_topk_cap)))
    # TODO(synk): if 3*pos_num[c] ever exceeds k_cap, the selection is
    # truncated at k_cap (bounded-k trade-off vs. the unbounded reference sort).
    neg_num = jnp.minimum(3.0 * pos_num, jnp.float32(k_cap))
    neg_vals, _ = jax.lax.top_k(con_neg, k_cap)          # (C, k_cap) descending
    col = jnp.arange(k_cap, dtype=f32)[None, :]
    closs_neg = jnp.sum(jnp.where(col < neg_num[:, None], neg_vals, 0.0))

    total = loss_l + closs_pos + closs_neg
    pos_total = jnp.sum(pos_num)
    # TODO(synk): reference divides by the per-class pos_num vector and calls
    # .item() on it (only well-defined for a scalar); we normalize by the total
    # positive count and return 0 when there are no positives.
    return jnp.where(pos_total > 0.0, total / pos_total, 0.0)


# ----------------------------------------------------------------------------
# Deterministic setup + run
# ----------------------------------------------------------------------------
def make_dboxes():
    """32 default boxes on an 8x4 grid in [0,1]^2, ltrb, deterministic."""
    gx, gy = 8, 4
    xs = (jnp.arange(gx, dtype=jnp.float32) + 0.5) / gx
    ys = (jnp.arange(gy, dtype=jnp.float32) + 0.5) / gy
    cx, cy = jnp.meshgrid(xs, ys, indexing="ij")
    cx = cx.reshape(-1)
    cy = cy.reshape(-1)
    w = jnp.full_like(cx, 0.2)
    h = jnp.full_like(cy, 0.2)
    ltrb = jnp.stack([cx - w / 2, cy - h / 2, cx + w / 2, cy + h / 2], axis=1)
    return jnp.clip(ltrb, 0.0, 1.0)


if __name__ == "__main__":
    B, N, C, M = 2, 32, 4, 3          # batch, num default boxes, classes, gt boxes
    match_threshold = 0.5             # reference hard-codes 0.5 in forward()

    key = jax.random.PRNGKey(0)
    k1, k2, k3, k4 = jax.random.split(key, 4)

    dboxes = make_dboxes()                                        # (N, 4)
    ploc = 0.1 * jax.random.normal(k1, (B, N, 4), jnp.float32)    # predicted boxes
    plabel = jax.random.normal(k2, (B, N, C), jnp.float32)        # class logits

    # gt boxes = slightly perturbed default boxes -> guaranteed positives
    gt_idx = jnp.array([[3, 12, 27], [5, 18, 30]], dtype=jnp.int32)
    noise = jax.random.uniform(k3, (B, M, 4), jnp.float32, -0.01, 0.01)
    gtloc = dboxes[gt_idx] + noise                                # (B, M, 4)
    gtlabel = jax.random.randint(k4, (B, M), 1, C).astype(jnp.int32)

    loss = ssd_loss(ploc, plabel, gtloc, gtlabel, dboxes, match_threshold, C)
    loss = jax.block_until_ready(loss)
    assert jnp.isfinite(loss)
    print("KERNEL_OK")
</pallas_src>

<mosaic_0001>
module attributes {stable_mosaic.version = 11 : i64} {
  func.func @_ssd_loss_kernel(%arg0: i32, %arg1: memref<4x128xf32, #tpu.memory_space<vmem>>, %arg2: memref<4x128xf32, #tpu.memory_space<vmem>>, %arg3: memref<1x128xf32, #tpu.memory_space<vmem>>, %arg4: memref<1x128xi32, #tpu.memory_space<vmem>>, %arg5: memref<8x128xf32, #tpu.memory_space<vmem>>, %arg6: memref<8x128xf32, #tpu.memory_space<vmem>>, %arg7: memref<1x1x128xf32, #tpu.memory_space<vmem>>) attributes {dimension_semantics = [#tpu.dimension_semantics<parallel>], iteration_bounds = array<i64: 1>, scalar_prefetch = 0 : i64, scratch_operands = 0 : i64, tpu.core_type = #tpu.core_type<tc>, window_params = [{transform_indices = @transform_0, window_bounds = array<i64: 4, 128>}, {transform_indices = @transform_1, window_bounds = array<i64: 4, 128>}, {transform_indices = @transform_2, window_bounds = array<i64: 1, 128>}, {transform_indices = @transform_3, window_bounds = array<i64: 1, 128>}, {transform_indices = @transform_4, window_bounds = array<i64: 8, 128>}, {transform_indices = @transform_5, window_bounds = array<i64: 8, 128>}, {transform_indices = @transform_6, window_bounds = array<i64: 1, 1, 128>}]} {
    %c0 = arith.constant 0 : index
    %c0_0 = arith.constant 0 : index
    %0 = vector.load %arg3[%c0, %c0_0] : memref<1x128xf32, #tpu.memory_space<vmem>>, vector<1x128xf32>
    %c0_1 = arith.constant 0 : index
    %c0_2 = arith.constant 0 : index
    %1 = vector.load %arg1[%c0_1, %c0_2] : memref<4x128xf32, #tpu.memory_space<vmem>>, vector<4x128xf32>
    %c0_3 = arith.constant 0 : index
    %c0_4 = arith.constant 0 : index
    %2 = vector.load %arg2[%c0_3, %c0_4] : memref<4x128xf32, #tpu.memory_space<vmem>>, vector<4x128xf32>
    %3 = arith.subf %1, %2 : vector<4x128xf32>
    %4 = math.absf %3 : vector<4x128xf32>
    %cst = arith.constant 1.000000e+00 : f32
    %5 = vector.broadcast %cst : f32 to vector<4x128xf32>
    %6 = arith.cmpf olt, %4, %5 : vector<4x128xf32>
    %cst_5 = arith.constant 5.000000e-01 : f32
    %7 = vector.broadcast %cst_5 : f32 to vector<4x128xf32>
    %8 = arith.mulf %7, %3 : vector<4x128xf32>
    %9 = arith.mulf %8, %3 : vector<4x128xf32>
    %cst_6 = arith.constant 5.000000e-01 : f32
    %10 = vector.broadcast %cst_6 : f32 to vector<4x128xf32>
    %11 = arith.subf %4, %10 : vector<4x128xf32>
    %12 = arith.select %6, %9, %11 : vector<4x128xi1>, vector<4x128xf32>
    %13 = vector.broadcast %0 : vector<1x128xf32> to vector<4x128xf32>
    %14 = arith.mulf %12, %13 : vector<4x128xf32>
    %15 = vector.shape_cast %14 : vector<4x128xf32> to vector<1x4x128xf32>
    %cst_7 = arith.constant dense<0.000000e+00> : vector<1xf32>
    %16 = vector.multi_reduction <add>, %15, %cst_7 [1, 2] : vector<1x4x128xf32> to vector<1xf32>
    %17 = vector.shape_cast %16 : vector<1xf32> to vector<1x1x1xf32>
    %18 = vector.extract %17[0, 0, 0] : f32 from vector<1x1x1xf32>
    %c0_8 = arith.constant 0 : index
    %c0_9 = arith.constant 0 : index
    %19 = vector.load %arg5[%c0_8, %c0_9] : memref<8x128xf32, #tpu.memory_space<vmem>>, vector<8x128xf32>
    %c0_10 = arith.constant 0 : index
    %c0_11 = arith.constant 0 : index
    %20 = vector.load %arg4[%c0_10, %c0_11] : memref<1x128xi32, #tpu.memory_space<vmem>>, vector<1x128xi32>
    %21 = tpu.iota {dimensions = array<i32: 0>} : vector<8x128xi32>
    %22 = vector.broadcast %20 : vector<1x128xi32> to vector<8x128xi32>
    %23 = arith.cmpi eq, %21, %22 : vector<8x128xi32>
    %24 = arith.extui %23 : vector<8x128xi1> to vector<8x128xi32>
    %25 = arith.sitofp %24 : vector<8x128xi32> to vector<8x128xf32>
    %cst_12 = arith.constant 0.000000e+00 : f32
    %26 = vector.broadcast %cst_12 : f32 to vector<8x128xf32>
    %27 = arith.maximumf %19, %26 : vector<8x128xf32>
    %28 = arith.mulf %19, %25 : vector<8x128xf32>
    %29 = arith.subf %27, %28 : vector<8x128xf32>
    %30 = math.absf %19 : vector<8x128xf32>
    %cst_13 = arith.constant 0.000000e+00 : f32
    %31 = vector.broadcast %cst_13 : f32 to vector<8x128xf32>
    %32 = arith.subf %31, %30 : vector<8x128xf32>
    %33 = math.exp %32 : vector<8x128xf32>
    %34 = math.log1p %33 : vector<8x128xf32>
    %35 = arith.addf %29, %34 : vector<8x128xf32>
    %36 = arith.mulf %35, %25 : vector<8x128xf32>
    %37 = vector.shape_cast %36 : vector<8x128xf32> to vector<1x8x128xf32>
    %cst_14 = arith.constant dense<0.000000e+00> : vector<1xf32>
    %38 = vector.multi_reduction <add>, %37, %cst_14 [1, 2] : vector<1x8x128xf32> to vector<1xf32>
    %39 = vector.shape_cast %38 : vector<1xf32> to vector<1x1x1xf32>
    %40 = vector.extract %39[0, 0, 0] : f32 from vector<1x1x1xf32>
    %41 = arith.subf %35, %36 : vector<8x128xf32>
    %c0_15 = arith.constant 0 : index
    %c0_16 = arith.constant 0 : index
    %42 = vector.load %arg6[%c0_15, %c0_16] : memref<8x128xf32, #tpu.memory_space<vmem>>, vector<8x128xf32>
    tpu.vector_store %arg6[%c0_15, %c0_16], %41 {strides = array<i32>} : memref<8x128xf32, #tpu.memory_space<vmem>>, vector<8x128xf32>,
    %43 = tpu.iota {dimensions = array<i32: 2>} : vector<1x1x128xi32>
    %c0_i32 = arith.constant 0 : i32
    %44 = vector.broadcast %c0_i32 : i32 to vector<1x1x128xi32>
    %45 = arith.cmpi eq, %43, %44 : vector<1x1x128xi32>
    %c1_i32 = arith.constant 1 : i32
    %46 = vector.broadcast %c1_i32 : i32 to vector<1x1x128xi32>
    %47 = arith.cmpi eq, %43, %46 : vector<1x1x128xi32>
    %cst_17 = arith.constant 0.000000e+00 : f32
    %48 = vector.broadcast %40 : f32 to vector<1x1x128xf32>
    %49 = vector.broadcast %cst_17 : f32 to vector<1x1x128xf32>
    %50 = arith.select %47, %48, %49 : vector<1x1x128xi1>, vector<1x1x128xf32>
    %51 = vector.broadcast %18 : f32 to vector<1x1x128xf32>
    %52 = arith.select %45, %51, %50 : vector<1x1x128xi1>, vector<1x1x128xf32>
    %c0_18 = arith.constant 0 : index
    %c0_19 = arith.constant 0 : index
    %c0_20 = arith.constant 0 : index
    %53 = vector.load %arg7[%c0_18, %c0_19, %c0_20] : memref<1x1x128xf32, #tpu.memory_space<vmem>>, vector<1x1x128xf32>
    tpu.vector_store %arg7[%c0_18, %c0_19, %c0_20], %52 {strides = array<i32>} : memref<1x1x128xf32, #tpu.memory_space<vmem>>, vector<1x1x128xf32>,
    return
  }
  func.func @transform_0(%arg0: i32) -> (i32, i32) {
    %c0_i32 = arith.constant 0 : i32
    %c0_i32_0 = arith.constant 0 : i32
    return %c0_i32, %arg0 : i32, i32
  }
  func.func @transform_1(%arg0: i32) -> (i32, i32) {
    %c0_i32 = arith.constant 0 : i32
    %c0_i32_0 = arith.constant 0 : i32
    return %c0_i32, %arg0 : i32, i32
  }
  func.func @transform_2(%arg0: i32) -> (i32, i32) {
    %c0_i32 = arith.constant 0 : i32
    %c0_i32_0 = arith.constant 0 : i32
    return %c0_i32, %arg0 : i32, i32
  }
  func.func @transform_3(%arg0: i32) -> (i32, i32) {
    %c0_i32 = arith.constant 0 : i32
    %c0_i32_0 = arith.constant 0 : i32
    return %c0_i32, %arg0 : i32, i32
  }
  func.func @transform_4(%arg0: i32) -> (i32, i32) {
    %c0_i32 = arith.constant 0 : i32
    %c0_i32_0 = arith.constant 0 : i32
    return %c0_i32, %arg0 : i32, i32
  }
  func.func @transform_5(%arg0: i32) -> (i32, i32) {
    %c0_i32 = arith.constant 0 : i32
    %c0_i32_0 = arith.constant 0 : i32
    return %c0_i32, %arg0 : i32, i32
  }
  func.func @transform_6(%arg0: i32) -> (i32, i32, i32) {
    %c0_i32 = arith.constant 0 : i32
    %c0_i32_0 = arith.constant 0 : i32
    %c0_i32_1 = arith.constant 0 : i32
    return %arg0, %c0_i32, %c0_i32_0 : i32, i32, i32
  }
}

</mosaic_0001>

<bundles_post_ra>
// kernel: ssd_loss.1
= control target key start
LH: loop header
LB: loop body
LE: loop exit
PB: predicated region body
PF: predicated region fallthrough
CT: control target
= control target key end

     0   :  { %v49_v11 = vlaneseq  ;;  %vm36_vm1 = vcmask 1043456   ;;  %v114_v21 = vmov 0.0   ;;  %s171_s0 = inlined_call_operand.vmem [shape: f32[4,128], index: 0, kind: input, shape index: {}]   ;;  %s172_s1 = inlined_call_operand.vmem [shape: f32[4,128], index: 1, kind: input, shape index: {}]   ;;  %s173_s2 = inlined_call_operand.vmem [shape: f32[1,128], index: 2, kind: input, shape index: {}]   ;;  %s174_s4 = inlined_call_operand.vmem [shape: f32[8,128], index: 4, kind: input, shape index: {}]   ;;  %s175_s3 = inlined_call_operand.vmem [shape: s32[1,128], index: 3, kind: input, shape index: {}]   ;;  %s176_s5 = inlined_call_operand.vmem [shape: f32[8,128], index: 5, kind: output, shape index: {0}]   ;;  %s177_s6 = inlined_call_operand.vmem [shape: f32[1,1,128], index: 6, kind: output, shape index: {1}]  }
   0x1   :  { %v23_v0 = vld [vmem:[%s171_s0] sm:$0xf] }
   0x2   :  { %v24_v1 = vld [vmem:[%s172_s1] sm:$0xf]  ;;  %v50_v15 = vshrl.u32 %v49_v11, 7  ;;  %v85_v49 = vand.u32 127, %v49_v11 }
   0x3   :  { %v25_v2 = vsub.f32 %v23_v0, %v24_v1  ;;  %v47_v3 = vld [vmem:[%s174_s4] sm:$0xff] }
   0x4   :  { %v58_v4 = vand.u32 2147483647, %v47_v3  ;;  %v108_v7 = vld [vmem:[%s173_s2] ss:$0 sm:$0xff]  ;;  %v55_v24 = vmax.f32 %v47_v3, 0.0  ;;  %vm87_vm4 = vcmp.eq.s32.totalorder %v85_v49, 1 }
   0x5   :  { %v26_v5 = vand.u32 2147483647, %v25_v2  ;;  %v28_v6 = vmul.f32 0.5, %v25_v2  ;;  %v109_v16 = vld [vmem:[%s175_s3] ss:$0 sm:$0xff]  ;;  %vm86_vm5 = vcmp.eq.s32.totalorder %v85_v49, 0 }
   0x6   :  { %v59_v8 = vsub.f32 0.0, %v58_v4  ;;  %vm52_vm2 = vcmp.eq.s32.totalorder %v50_v15, %v109_v16 }
   0x7   :  { %vm27_vm0 = vcmp.lt.f32.partialorder %v26_v5, 1.0  ;;  %v29_v9 = vmul.f32 %v28_v6, %v25_v2  ;;  %v101_v10 = vadd.f32 -0.5, %v26_v5  ;;  %v102_v22 = vsel %vm52_vm2, 1.0, %v114_v21 }
   0x8   :  { %v60_v12 = vmul.f32 1.442695, %v59_v8  ;;  %v56_v25 = vmul.f32 %v102_v22, %v47_v3 }
   0x9   :  { %v31_v13 = vsel %vm27_vm0, %v29_v9, %v101_v10 }
   0xa   :  { %v35_v14 = vmul.f32 %v108_v7, %v31_v13  ;;  %110 = vpow2.f32 %v60_v12  ;;  %v57_v29 = vsub.f32 %v55_v24, %v56_v25 }
   0xc   :  { %v37_v17 = vsel %vm36_vm1, %v35_v14, 0.0 }
   0xd   :  { %38 = vadd.xlane.f32.xlu0 %v37_v17 }
  0x10   :  { %v111_v18 = vpop.eup %110 }
  0x11   :  { %v62_v19 = vadd.f32 1.0, %v111_v18  ;;  %v65_v20 = vmul.f32 -0.5, %v111_v18  ;;  %v68_v26 = vand.u32 2147483647, %v111_v18 }
  0x13   :  { %112 = vlog2.f32 %v62_v19  ;;  %v66_v23 = vadd.f32 1.0, %v65_v20  ;;  %vm69_vm3 = vcmp.lt.f32.partialorder %v68_v26, 0.0004427343 }
  0x15   :  { %v67_v27 = vmul.f32 %v111_v18, %v66_v23 }
  0x19   :  { %v113_v28 = vpop.eup %112 }
  0x1a   :  { %v64_v30 = vmul.f32 0.6931472, %v113_v28 }
  0x1c   :  { %v70_v31 = vsel %vm69_vm3, %v67_v27, %v64_v30 }
  0x1d   :  { %v71_v32 = vadd.f32 %v70_v31, %v57_v29 }
  0x1f   :  { %v72_v33 = vmul.f32 %v102_v22, %v71_v32 }
  0x21   :  { %v82_v34 = vsub.f32 %v71_v32, %v72_v33  ;;  %73 = vadd.xlane.f32.xlu0 %v72_v33 }
  0x23   :  { %83 = vst [vmem:[%s176_s5] sm:$0xff] %v82_v34 }
  0x80   :  { %v39_v35 = vpop.xlane.xlu0 %38 }
  0x81   :  { %v40_v36 = vrot.slane %v39_v35, 4 }
  0x83   :  { %v41_v37 = vadd.f32 %v40_v36, %v39_v35 }
  0x85   :  { %v42_v38 = vrot.slane %v41_v37, 2 }
  0x87   :  { %v43_v39 = vadd.f32 %v42_v38, %v41_v37 }
  0x89   :  { %v44_v40 = vrot.slane %v43_v39, 1 }
  0x8b   :  { %v45_v41 = vadd.f32 %v44_v40, %v43_v39 }
  0x8d   :  { %103 = vpush %v45_v41 }
  0x94   :  { %v74_v42 = vpop.xlane.xlu0 %73 }
  0x95   :  { %v75_v43 = vrot.slane %v74_v42, 4 }
  0x97   :  { %v76_v44 = vadd.f32 %v75_v43, %v74_v42 }
  0x99   :  { %v77_v45 = vrot.slane %v76_v44, 2 }
  0x9b   :  { %v78_v46 = vadd.f32 %v77_v45, %v76_v44 }
  0x9d   :  { %v79_v47 = vrot.slane %v78_v46, 1 }
  0x9f   :  { %v80_v48 = vadd.f32 %v79_v47, %v78_v46 }
  0xa1   :  { %105 = vpush %v80_v48 }
  0xbe   :  { %s104_s4 = spop %103 }
  0xbf   :  { %v90_v51 = vstv %s104_s4 }
  0xd2   :  { %s106_s5 = spop %105 }
  0xd3   :  { %v88_v50 = vstv %s106_s5 }
  0xd4   :  { %v89_v52 = vsel %vm87_vm4, %v88_v50, 0.0 }
  0xd5   :  { %v91_v53 = vsel %vm86_vm5, %v90_v51, %v89_v52 }
  0xd6   :  { %92 = vst [vmem:[%s177_s6] sm:$0x1] %v91_v53 }

</bundles_post_ra>
